<compile_context>
chip_gen: v7x
topology: tpu7x:2x2x1
jax: 0.10.0
libtpu: 0.0.40
codegen_flags: <defaults>
</compile_context>

<pallas_src>
import math

import jax
import jax.numpy as jnp
from jax.experimental import pallas as pl
from jax.experimental.pallas import tpu as pltpu

_SQRT_2_OVER_PI = math.sqrt(2.0 / math.pi)
_GELU_COEFF = 0.044715

_LANES = 512                    # lane-dense last dim (multiple of 128)
_TARGET_TILE_BYTES = 2 << 20    # ~2 MiB f32 input tile per grid step


def _gelu_kernel(x_ref, o_ref):
    # Upcast to f32 for the math (explicit on v5e where VPU/EUP lack bf16).
    x = x_ref[...].astype(jnp.float32)
    x_sq = x * x
    # Horner form: sqrt(2/pi) * x * (1 + c * x^2)  (one fewer vmul than x + c*x^3).
    inner = _SQRT_2_OVER_PI * x * (1.0 + _GELU_COEFF * x_sq)
    y = 0.5 * x * (1.0 + jnp.tanh(inner))           # tanh lowers to the EUP slot
    o_ref[...] = y.astype(o_ref.dtype)


def gelu(x: jax.Array) -> jax.Array:
    """Tanh-approx GeLU matching the PyTorch reference, any shape / dtype."""
    orig_shape = x.shape
    orig_dtype = x.dtype

    n = x.size
    if n == 0:
        return x

    # Flatten to a lane-dense 2-D slab [rows, _LANES]; pad the tail (gelu(0)=0,
    # and the padded tail is sliced off anyway).  Glue only, no compute.
    flat = x.reshape(-1)
    n_pad = pl.cdiv(n, _LANES) * _LANES
    if n_pad != n:
        flat = jnp.pad(flat, (0, n_pad - n))
    rows = n_pad // _LANES
    x2 = flat.reshape(rows, _LANES)

    # ~2 MiB (f32) row tiles.  target_rows is a multiple of 8; if the array is
    # smaller than one tile, use the full row extent (full-dim block is always
    # legal under the (8,128) rule).
    target_rows = max(8, _TARGET_TILE_BYTES // (_LANES * 4))   # = 1024
    block_rows = rows if rows <= target_rows else target_rows

    grid = (pl.cdiv(rows, block_rows),)   # Pallas masks the ragged edge block

    elem_bytes = jnp.dtype(orig_dtype).itemsize
    cost = pl.CostEstimate(
        flops=8 * n,
        transcendentals=n,
        bytes_accessed=2 * n * elem_bytes,
    )

    out = pl.pallas_call(
        _gelu_kernel,
        out_shape=jax.ShapeDtypeStruct((rows, _LANES), orig_dtype),
        grid_spec=pltpu.PrefetchScalarGridSpec(
            num_scalar_prefetch=0,
            grid=grid,
            in_specs=[pl.BlockSpec((block_rows, _LANES), lambda i: (i, 0))],
            out_specs=pl.BlockSpec((block_rows, _LANES), lambda i: (i, 0)),
        ),
        compiler_params=pltpu.CompilerParams(
            dimension_semantics=("parallel",),     # v7x: shard grid over 2 TCs
            vmem_limit_bytes=64 << 20,             # headroom for 2x(in+out) tiles
        ),
        cost_estimate=cost,
    )(x2)

    return out.reshape(-1)[:n].reshape(orig_shape)


def _gelu_ref(x):
    # Pure-JAX reference mirroring the PyTorch forward.
    xf = x.astype(jnp.float32)
    y = 0.5 * xf * (1.0 + jnp.tanh(_SQRT_2_OVER_PI * (xf + _GELU_COEFF * jnp.power(xf, 3))))
    return y.astype(x.dtype)


if __name__ == "__main__":
    key = jax.random.PRNGKey(0)

    # BERT-style activation shape [batch, seq, hidden].
    batch, seq, hidden = 2, 8, 32
    x = jax.random.normal(key, (batch, seq, hidden), dtype=jnp.float32)

    y = jax.block_until_ready(gelu(x))
    y_ref = _gelu_ref(x)
    assert y.shape == x.shape and y.dtype == x.dtype
    assert jnp.allclose(y, y_ref, atol=1e-5, rtol=1e-5), "mismatch vs reference"

    # Irregular shape to exercise the padding / ragged-edge path.
    x2 = jax.random.normal(jax.random.PRNGKey(1), (3, 17, 96), dtype=jnp.float32)
    y2 = jax.block_until_ready(gelu(x2))
    assert jnp.allclose(y2, _gelu_ref(x2), atol=1e-5, rtol=1e-5), "mismatch (irregular shape)"

    print("KERNEL_OK")
</pallas_src>

<mosaic_0001>
module attributes {stable_mosaic.version = 11 : i64} {
  func.func @_gelu_kernel(%arg0: i32, %arg1: memref<1x512xf32, #tpu.memory_space<vmem>>, %arg2: memref<1x512xf32, #tpu.memory_space<vmem>>) attributes {dimension_semantics = [#tpu.dimension_semantics<parallel>], iteration_bounds = array<i64: 1>, scalar_prefetch = 0 : i64, scratch_operands = 0 : i64, tpu.core_type = #tpu.core_type<tc>, window_params = [{transform_indices = @transform_0, window_bounds = array<i64: 1, 512>}, {transform_indices = @transform_1, window_bounds = array<i64: 1, 512>}]} {
    %c0 = arith.constant 0 : index
    %c0_0 = arith.constant 0 : index
    %0 = vector.load %arg1[%c0, %c0_0] : memref<1x512xf32, #tpu.memory_space<vmem>>, vector<1x512xf32>
    %1 = arith.mulf %0, %0 : vector<1x512xf32>
    %cst = arith.constant 0.797884583 : f32
    %2 = vector.broadcast %cst : f32 to vector<1x512xf32>
    %3 = arith.mulf %2, %0 : vector<1x512xf32>
    %cst_1 = arith.constant 4.471500e-02 : f32
    %4 = vector.broadcast %cst_1 : f32 to vector<1x512xf32>
    %5 = arith.mulf %4, %1 : vector<1x512xf32>
    %cst_2 = arith.constant 1.000000e+00 : f32
    %6 = vector.broadcast %cst_2 : f32 to vector<1x512xf32>
    %7 = arith.addf %6, %5 : vector<1x512xf32>
    %8 = arith.mulf %3, %7 : vector<1x512xf32>
    %cst_3 = arith.constant 5.000000e-01 : f32
    %9 = vector.broadcast %cst_3 : f32 to vector<1x512xf32>
    %10 = arith.mulf %9, %0 : vector<1x512xf32>
    %11 = math.tanh %8 : vector<1x512xf32>
    %cst_4 = arith.constant 1.000000e+00 : f32
    %12 = vector.broadcast %cst_4 : f32 to vector<1x512xf32>
    %13 = arith.addf %12, %11 : vector<1x512xf32>
    %14 = arith.mulf %10, %13 : vector<1x512xf32>
    %c0_5 = arith.constant 0 : index
    %c0_6 = arith.constant 0 : index
    %15 = vector.load %arg2[%c0_5, %c0_6] : memref<1x512xf32, #tpu.memory_space<vmem>>, vector<1x512xf32>
    tpu.vector_store %arg2[%c0_5, %c0_6], %14 {strides = array<i32>} : memref<1x512xf32, #tpu.memory_space<vmem>>, vector<1x512xf32>,
    return
  }
  func.func @transform_0(%arg0: i32) -> (i32, i32) {
    %c0_i32 = arith.constant 0 : i32
    %c0_i32_0 = arith.constant 0 : i32
    return %arg0, %c0_i32 : i32, i32
  }
  func.func @transform_1(%arg0: i32) -> (i32, i32) {
    %c0_i32 = arith.constant 0 : i32
    %c0_i32_0 = arith.constant 0 : i32
    return %arg0, %c0_i32 : i32, i32
  }
}

</mosaic_0001>

<bundles_post_ra>
// kernel: tpu_custom_call.1
= control target key start
LH: loop header
LB: loop body
LE: loop exit
PB: predicated region body
PF: predicated region fallthrough
CT: control target
= control target key end

     0   :  { %6 = vsyncpa [#allocation3], 0  ;;  %s139_s0 = inlined_call_operand.hbm [shape: f32[1,512], index: 0, kind: input, shape index: {}]   ;;  %s140_s1 = inlined_call_operand.hbm [shape: f32[1,512], index: 1, kind: output, shape index: {}]  }
   0x1   :  { %7 = vsyncpa [#allocation4], 0  ;;  %s103_s6 = smov [#allocation2]   ;;  %s55_s10 = scalar_lea.hbm %s139_s0, 64 }
   0x2   :  { %s14_s7 = sshll.u32 %s103_s6, 4  ;;  %p56_p0 = scmp.ne.s32.totalorder %s139_s0, %s55_s10  ;;  %s15_s7 = int_to_ptr.vmem [resolvable:$true] %s14_s7 }
   0x3   :  { %p59_p1 = scmp.lt.u32.totalorder %s55_s10, %s139_s0 }
   0x5   :  { %p61_p2 = pnand %p59_p1, %p56_p0 }
   0x7   :  { %64 = shalt.err (!%p61_p2)
}
   0x8   :  { %s65_s15 = scalar_lea.vmem %s15_s7, 64  ;;  %p70_p4 = scmp.lt.s32.totalorder %s15_s7, %s15_s7 }
   0x9   :  { %p66_p3 = scmp.ne.s32.totalorder %s15_s7, %s65_s15  ;;  %p71_p5 = scmp.lt.s32.totalorder %s65_s15, %s65_s15 }
   0xb   :  { %p72_p6 = por %p71_p5, %p70_p4 }
   0xd   :  { %p73_p7 = pnand %p72_p6, %p66_p3 }
   0xf   :  { %76 = shalt.err (!%p73_p7)
}
  0x10   :  { %17 = dma.hbm_to_vmem [thread:$0]  %s139_s0, 64, %s15_s7, [#allocation3]  }
  0x11   :  { %99 = dma.done.wait [#allocation3], 64  }
  0x12   :  { %100 = vsyncadd [#allocation3], 4294967232  ;;  %v21_v0 = vld [vmem:[#allocation2] sm:$0xf]  ;;  %v31_v6 = vlaneseq  ;;  %s104_s18 = smov [#allocation5]  }
  0x13   :  { %v22_v1 = vmul.f32 %v21_v0, %v21_v0  ;;  %v23_v2 = vmul.f32 0.7978846, %v21_v0  ;;  %v27_v7 = vmul.f32 0.5, %v21_v0  ;;  %s42_s19 = sshll.u32 %s104_s18, 4  ;;  %s43_s19 = int_to_ptr.vmem [resolvable:$true] %s42_s19 }
  0x14   :  { %vm33_vm0 = vcmp.lt.s32.totalorder %v31_v6, 512  ;;  %s77_s0 = scalar_lea.vmem %s43_s19, 64  ;;  %p82_p9 = scmp.lt.s32.totalorder %s43_s19, %s43_s19 }
  0x15   :  { %v24_v3 = vmul.f32 0.044715, %v22_v1  ;;  %p78_p8 = scmp.ne.s32.totalorder %s43_s19, %s77_s0  ;;  %p83_p10 = scmp.lt.s32.totalorder %s77_s0, %s77_s0 }
  0x17   :  { %v25_v4 = vadd.f32 1.0, %v24_v3  ;;  %p84_p11 = por %p83_p10, %p82_p9 }
  0x19   :  { %v26_v5 = vmul.f32 %v25_v4, %v23_v2  ;;  %p85_p12 = pnand %p84_p11, %p78_p8 }
  0x1b   :  { %53 = vtanh.f32 %v26_v5 }
  0x25   :  { %v54_v8 = vpop.eup %53 }
  0x26   :  { %v29_v9 = vadd.f32 1.0, %v54_v8 }
  0x28   :  { %v30_v10 = vmul.f32 %v29_v9, %v27_v7 }
  0x2a   :  { %35 = vst.msk [vmem:[#allocation5] sm:$0xf] %vm33_vm0, %v30_v10 }
  0x2b   :  { %88 = shalt.err (!%p85_p12)
}
  0x2c   :  { %s89_s22 = scalar_lea.hbm %s140_s1, 64 }
  0x2d   :  { %p90_p13 = scmp.ne.s32.totalorder %s140_s1, %s89_s22  ;;  %p93_p0 = scmp.lt.u32.totalorder %s89_s22, %s140_s1 }
  0x2f   :  { %p95_p1 = pnand %p93_p0, %p90_p13 }
  0x31   :  { %98 = shalt.err (!%p95_p1)
}
  0x32   :  { %45 = dma.vmem_to_hbm [thread:$0]  %s43_s19, 64, %s140_s1, [#allocation4]  }
  0x33   :  { %101 = dma.done.wait [#allocation4], 64  }
  0x34   :  { %102 = vsyncadd [#allocation4], 4294967232 }
  0x35   :  { %49 = vsyncpa [#allocation3], 1 }
  0x36   :  { %50 = vsyncpa [#allocation4], 1 }

</bundles_post_ra>
